<compile_context>
chip_gen: v7x
topology: tpu7x:2x2x1
jax: 0.10.0
libtpu: 0.0.40
codegen_flags: <defaults>
</compile_context>

<pallas_src>
import numpy as np
import jax
import jax.numpy as jnp
from jax import lax
from jax.experimental import pallas as pl
from jax.experimental.pallas import tpu as pltpu

EPS = 1e-5          # InstanceNorm2d default eps
NEG_SLOPE = 0.2     # LeakyReLU(0.2)


def up_conv_kernel(d_ref, wr_ref, p_ref, pt_ref, o_ref):
    """One batch image per grid step.

    d_ref : (1, H2, K)        VMEM  lane-dense packed low-res rows (phase-folded im2col)
    wr_ref: (K, Cout*W2)      VMEM  folded upsample+conv3x3+interleave weight matrix
    p_ref : (Cout*W2, Cout)   VMEM  0/1 lane-group -> channel gather matrix
    pt_ref: (Cout, Cout*W2)   VMEM  0/1 channel -> lane-group scatter matrix (P^T)
    o_ref : (1, H2, Cout*W2)  VMEM  packed output slab; column index = cout*W2 + j2
    """
    h2 = d_ref.shape[1]
    cw = o_ref.shape[2]
    cout = p_ref.shape[1]
    inv_npix = 1.0 / float(h2 * (cw // cout))     # 1 / (H2*W2), static

    # Upsample + conv3x3 + 2x2 phase interleave: a single MXU matmul.
    z = jnp.dot(d_ref[0], wr_ref[...], preferred_element_type=jnp.float32)   # (H2, CW)

    # InstanceNorm2d (affine=False, biased variance), per channel = per 32-lane group.
    # (Conv bias is omitted: it is exactly cancelled by this mean subtraction.)
    def group_bcast(t):   # sum within each channel's lane group, broadcast back to lanes
        g = jnp.dot(t, p_ref[...], preferred_element_type=jnp.float32)        # (H2, Cout)
        return jnp.dot(g, pt_ref[...], preferred_element_type=jnp.float32)    # (H2, CW)

    mean_b = jnp.sum(group_bcast(z), axis=0, keepdims=True) * inv_npix        # (1, CW)
    zc = z - mean_b
    var_b = jnp.sum(group_bcast(zc * zc), axis=0, keepdims=True) * inv_npix   # (1, CW)
    zn = zc * lax.rsqrt(var_b + EPS)

    # LeakyReLU(0.2)
    o_ref[0] = jnp.where(zn > 0, zn, NEG_SLOPE * zn).astype(o_ref.dtype)


def up_conv_forward(x_nchw, weight, bias=None):
    """x_nchw: (N, Cin, H, W) f32; weight: (Cout, Cin, 3, 3) OIHW; bias: (Cout,) (unused:
    it is mathematically cancelled by InstanceNorm(affine=False)).
    Returns (N, Cout, 2H, 2W) NCHW, matching PyTorch."""
    del bias  # exactly cancelled by the InstanceNorm mean subtraction (see kernel comment)

    N, Cin, H, W = x_nchw.shape
    Cout = weight.shape[0]
    H2, W2 = 2 * H, 2 * W
    Wp2 = W + 2
    half_k = Cin * 2 * Wp2          # (cin, u, jp) block for one output-row phase a
    K = 2 * half_k                  # both row phases a' in {0,1}
    CW = Cout * W2

    f32 = jnp.float32
    w = weight.astype(f32)

    # ---- Weight folding (static, done once): Upsample(2x nearest)+Conv3x3 -> phase taps.
    # R[a, u, ky] = 1 iff 3x3 tap-row ky contributes to output phase-row a via low-res row
    # offset u (indices into the 1-pixel-padded low-res image at row i + a + u).
    R = jnp.array([[[1., 0., 0.], [0., 1., 1.]],
                   [[1., 1., 0.], [0., 0., 1.]]], dtype=f32)
    Wp = jnp.einsum('auk,bvl,oikl->oiabuv', R, R, w)          # (Cout, Cin, 2, 2, 2, 2)

    # Column selector folding the column-phase interleave into the weight matrix:
    # Csel[b, v, jp, j2] = 1 iff output column j2 = 2j+b uses padded low-res column jp=j+b+v.
    Csel = np.zeros((2, 2, Wp2, W2), np.float32)
    for b in (0, 1):
        for v in (0, 1):
            for j in range(W):
                Csel[b, v, j + b + v, 2 * j + b] = 1.0
    Csel = jnp.asarray(Csel)
    WR = jnp.einsum('ocabuv,bvpq->acupoq', Wp, Csel)          # (2, Cin, 2, Wp2, Cout, W2)
    WR = WR.reshape(K, CW)                                    # (288, 256) for the test size

    # ---- Data packing (wrapper-side layout only, ~36 KiB/batch): padded LOW-RES rows.
    # D[n, 2i+a, (a', c, u, jp)] = Xpad[n, c, i+a+u, jp] if a' == a else 0.
    xp = jnp.pad(x_nchw.astype(f32), ((0, 0), (0, 0), (1, 1), (1, 1)))   # (N, Cin, H+2, W+2)

    def rows_for_phase(a):
        sl = jnp.stack([xp[:, :, a + u:a + u + H, :] for u in (0, 1)], axis=2)  # (N,Cin,2,H,Wp2)
        sl = jnp.transpose(sl, (0, 3, 1, 2, 4))                                  # (N,H,Cin,2,Wp2)
        return sl.reshape(N, H, half_k)

    D = jnp.zeros((N, H2, 2, half_k), f32)
    D = D.at[:, 0::2, 0, :].set(rows_for_phase(0))
    D = D.at[:, 1::2, 1, :].set(rows_for_phase(1))
    D = D.reshape(N, H2, K)

    # ---- Per-channel lane-group gather/scatter constants for the InstanceNorm stats.
    lane_ch = np.arange(CW) // W2
    P_np = (lane_ch[:, None] == np.arange(Cout)[None, :]).astype(np.float32)    # (CW, Cout)
    P = jnp.asarray(P_np)
    Pt = jnp.asarray(P_np.T)                                                     # (Cout, CW)

    flops = int(2 * N * H2 * K * CW              # main conv matmul
                + 2 * N * 4 * H2 * CW * Cout)    # group-stat matmuls
    bytes_accessed = int(4 * (D.size + WR.size + P.size + Pt.size + N * H2 * CW))

    packed = pl.pallas_call(
        up_conv_kernel,
        out_shape=jax.ShapeDtypeStruct((N, H2, CW), x_nchw.dtype),
        grid_spec=pltpu.PrefetchScalarGridSpec(
            num_scalar_prefetch=0,
            grid=(N,),
            in_specs=[
                pl.BlockSpec((1, H2, K), lambda n: (n, 0, 0)),     # data rows
                pl.BlockSpec((K, CW), lambda n: (0, 0)),           # folded weights
                pl.BlockSpec((CW, Cout), lambda n: (0, 0)),        # P
                pl.BlockSpec((Cout, CW), lambda n: (0, 0)),        # P^T
            ],
            out_specs=pl.BlockSpec((1, H2, CW), lambda n: (n, 0, 0)),
        ),
        compiler_params=pltpu.CompilerParams(
            dimension_semantics=("parallel",)),
        cost_estimate=pl.CostEstimate(
            flops=flops, transcendentals=int(N * CW),
            bytes_accessed=bytes_accessed),
    )(D, WR, P, Pt)

    # Un-pack the small (N * H2 * Cout*W2 * 4 B) result: (N, H2, Cout, W2) -> NCHW.
    return packed.reshape(N, H2, Cout, W2).transpose(0, 2, 1, 3)


def up_conv_reference(x_nchw, weight, bias):
    """Pure-JAX reference matching PyTorch semantics (for correctness check)."""
    x = jnp.repeat(jnp.repeat(x_nchw, 2, axis=2), 2, axis=3)
    y = lax.conv_general_dilated(
        x, weight, window_strides=(1, 1), padding=((1, 1), (1, 1)),
        dimension_numbers=("NCHW", "OIHW", "NCHW"))
    y = y + bias.reshape(1, -1, 1, 1)
    mean = y.mean(axis=(2, 3), keepdims=True)
    var = ((y - mean) ** 2).mean(axis=(2, 3), keepdims=True)
    y = (y - mean) / jnp.sqrt(var + EPS)
    return jnp.where(y > 0, y, NEG_SLOPE * y)


if __name__ == "__main__":
    # N=2, ch_in=4, ch_out=8, spatial 16x16 -> output (2, 8, 32, 32)
    N, CH_IN, CH_OUT, H, W = 2, 4, 8, 16, 16

    key = jax.random.PRNGKey(0)
    kx, kw, kb = jax.random.split(key, 3)
    x = jax.random.normal(kx, (N, CH_IN, H, W), dtype=jnp.float32)
    weight = 0.1 * jax.random.normal(kw, (CH_OUT, CH_IN, 3, 3), dtype=jnp.float32)
    bias = 0.1 * jax.random.normal(kb, (CH_OUT,), dtype=jnp.float32)

    out = up_conv_forward(x, weight, bias)
    out = jax.block_until_ready(out)

    ref = jax.block_until_ready(up_conv_reference(x, weight, bias))
    assert out.shape == (N, CH_OUT, 2 * H, 2 * W), out.shape
    assert jnp.allclose(out, ref, atol=1e-4, rtol=1e-4), "mismatch vs reference"

    print("KERNEL_OK")
</pallas_src>

<mosaic_0001>
module attributes {stable_mosaic.version = 11 : i64} {
  func.func @up_conv_kernel(%arg0: i32, %arg1: memref<1x32x288xf32, #tpu.memory_space<vmem>>, %arg2: memref<288x256xf32, #tpu.memory_space<vmem>>, %arg3: memref<256x8xf32, #tpu.memory_space<vmem>>, %arg4: memref<8x256xf32, #tpu.memory_space<vmem>>, %arg5: memref<1x32x256xf32, #tpu.memory_space<vmem>>) attributes {dimension_semantics = [#tpu.dimension_semantics<parallel>], iteration_bounds = array<i64: 2>, scalar_prefetch = 0 : i64, scratch_operands = 0 : i64, tpu.core_type = #tpu.core_type<tc>, window_params = [{transform_indices = @transform_0, window_bounds = array<i64: 1, 32, 288>}, {pipeline_mode = #tpu.pipeline_mode<synchronous>, transform_indices = @transform_1, window_bounds = array<i64: 288, 256>}, {pipeline_mode = #tpu.pipeline_mode<synchronous>, transform_indices = @transform_2, window_bounds = array<i64: 256, 8>}, {pipeline_mode = #tpu.pipeline_mode<synchronous>, transform_indices = @transform_3, window_bounds = array<i64: 8, 256>}, {transform_indices = @transform_4, window_bounds = array<i64: 1, 32, 256>}]} {
    %c0 = arith.constant 0 : index
    %c0_0 = arith.constant 0 : index
    %c0_1 = arith.constant 0 : index
    %0 = vector.load %arg1[%c0, %c0_0, %c0_1] : memref<1x32x288xf32, #tpu.memory_space<vmem>>, vector<1x32x288xf32>
    %1 = vector.shape_cast %0 : vector<1x32x288xf32> to vector<32x288xf32>
    %c0_2 = arith.constant 0 : index
    %c0_3 = arith.constant 0 : index
    %2 = vector.load %arg2[%c0_2, %c0_3] : memref<288x256xf32, #tpu.memory_space<vmem>>, vector<288x256xf32>
    %cst = arith.constant dense<0.000000e+00> : vector<32x256xf32>
    %3 = tpu.matmul %1, %2, %cst {dimension_numbers = #tpu.dot_dimension_numbers<[1], [0], [0], [1], [0, 0, 1, 1], [], []>} : vector<32x288xf32>, vector<288x256xf32>, vector<32x256xf32> -> vector<32x256xf32>
    %c0_4 = arith.constant 0 : index
    %c0_5 = arith.constant 0 : index
    %4 = vector.load %arg3[%c0_4, %c0_5] : memref<256x8xf32, #tpu.memory_space<vmem>>, vector<256x8xf32>
    %cst_6 = arith.constant dense<0.000000e+00> : vector<32x8xf32>
    %5 = tpu.matmul %3, %4, %cst_6 {dimension_numbers = #tpu.dot_dimension_numbers<[1], [0], [0], [1], [0, 0, 1, 1], [], []>} : vector<32x256xf32>, vector<256x8xf32>, vector<32x8xf32> -> vector<32x8xf32>
    %c0_7 = arith.constant 0 : index
    %c0_8 = arith.constant 0 : index
    %6 = vector.load %arg4[%c0_7, %c0_8] : memref<8x256xf32, #tpu.memory_space<vmem>>, vector<8x256xf32>
    %cst_9 = arith.constant dense<0.000000e+00> : vector<32x256xf32>
    %7 = tpu.matmul %5, %6, %cst_9 {dimension_numbers = #tpu.dot_dimension_numbers<[1], [0], [0], [1], [0, 0, 1, 1], [], []>} : vector<32x8xf32>, vector<8x256xf32>, vector<32x256xf32> -> vector<32x256xf32>
    %cst_10 = arith.constant dense<0.000000e+00> : vector<256xf32>
    %8 = vector.multi_reduction <add>, %7, %cst_10 [0] : vector<32x256xf32> to vector<256xf32>
    %9 = vector.shape_cast %8 : vector<256xf32> to vector<1x256xf32>
    %cst_11 = arith.constant 9.765625E-4 : f32
    %10 = vector.broadcast %cst_11 : f32 to vector<1x256xf32>
    %11 = arith.mulf %9, %10 : vector<1x256xf32>
    %12 = vector.broadcast %11 : vector<1x256xf32> to vector<32x256xf32>
    %13 = arith.subf %3, %12 : vector<32x256xf32>
    %14 = arith.mulf %13, %13 : vector<32x256xf32>
    %c0_12 = arith.constant 0 : index
    %c0_13 = arith.constant 0 : index
    %15 = vector.load %arg3[%c0_12, %c0_13] : memref<256x8xf32, #tpu.memory_space<vmem>>, vector<256x8xf32>
    %cst_14 = arith.constant dense<0.000000e+00> : vector<32x8xf32>
    %16 = tpu.matmul %14, %15, %cst_14 {dimension_numbers = #tpu.dot_dimension_numbers<[1], [0], [0], [1], [0, 0, 1, 1], [], []>} : vector<32x256xf32>, vector<256x8xf32>, vector<32x8xf32> -> vector<32x8xf32>
    %c0_15 = arith.constant 0 : index
    %c0_16 = arith.constant 0 : index
    %17 = vector.load %arg4[%c0_15, %c0_16] : memref<8x256xf32, #tpu.memory_space<vmem>>, vector<8x256xf32>
    %cst_17 = arith.constant dense<0.000000e+00> : vector<32x256xf32>
    %18 = tpu.matmul %16, %17, %cst_17 {dimension_numbers = #tpu.dot_dimension_numbers<[1], [0], [0], [1], [0, 0, 1, 1], [], []>} : vector<32x8xf32>, vector<8x256xf32>, vector<32x256xf32> -> vector<32x256xf32>
    %cst_18 = arith.constant dense<0.000000e+00> : vector<256xf32>
    %19 = vector.multi_reduction <add>, %18, %cst_18 [0] : vector<32x256xf32> to vector<256xf32>
    %20 = vector.shape_cast %19 : vector<256xf32> to vector<1x256xf32>
    %cst_19 = arith.constant 9.765625E-4 : f32
    %21 = vector.broadcast %cst_19 : f32 to vector<1x256xf32>
    %22 = arith.mulf %20, %21 : vector<1x256xf32>
    %cst_20 = arith.constant 9.99999974E-6 : f32
    %23 = vector.broadcast %cst_20 : f32 to vector<1x256xf32>
    %24 = arith.addf %22, %23 : vector<1x256xf32>
    %25 = math.rsqrt %24 : vector<1x256xf32>
    %26 = vector.broadcast %25 : vector<1x256xf32> to vector<32x256xf32>
    %27 = arith.mulf %13, %26 : vector<32x256xf32>
    %cst_21 = arith.constant 0.000000e+00 : f32
    %28 = vector.broadcast %cst_21 : f32 to vector<32x256xf32>
    %29 = arith.cmpf ogt, %27, %28 : vector<32x256xf32>
    %cst_22 = arith.constant 2.000000e-01 : f32
    %30 = vector.broadcast %cst_22 : f32 to vector<32x256xf32>
    %31 = arith.mulf %30, %27 : vector<32x256xf32>
    %32 = arith.select %29, %27, %31 : vector<32x256xi1>, vector<32x256xf32>
    %c0_23 = arith.constant 0 : index
    %c0_24 = arith.constant 0 : index
    %c0_25 = arith.constant 0 : index
    %33 = vector.load %arg5[%c0_23, %c0_24, %c0_25] : memref<1x32x256xf32, #tpu.memory_space<vmem>>, vector<1x32x256xf32>
    %34 = vector.shape_cast %33 : vector<1x32x256xf32> to vector<32x256xf32>
    %35 = vector.shape_cast %32 : vector<32x256xf32> to vector<1x32x256xf32>
    tpu.vector_store %arg5[%c0_23, %c0_24, %c0_25], %35 {strides = array<i32>} : memref<1x32x256xf32, #tpu.memory_space<vmem>>, vector<1x32x256xf32>,
    return
  }
  func.func @transform_0(%arg0: i32) -> (i32, i32, i32) {
    %c0_i32 = arith.constant 0 : i32
    %c0_i32_0 = arith.constant 0 : i32
    %c0_i32_1 = arith.constant 0 : i32
    return %arg0, %c0_i32, %c0_i32_0 : i32, i32, i32
  }
  func.func @transform_1(%arg0: i32) -> (i32, i32) {
    %c0_i32 = arith.constant 0 : i32
    %c0_i32_0 = arith.constant 0 : i32
    %c0_i32_1 = arith.constant 0 : i32
    return %c0_i32, %c0_i32_0 : i32, i32
  }
  func.func @transform_2(%arg0: i32) -> (i32, i32) {
    %c0_i32 = arith.constant 0 : i32
    %c0_i32_0 = arith.constant 0 : i32
    %c0_i32_1 = arith.constant 0 : i32
    return %c0_i32, %c0_i32_0 : i32, i32
  }
  func.func @transform_3(%arg0: i32) -> (i32, i32) {
    %c0_i32 = arith.constant 0 : i32
    %c0_i32_0 = arith.constant 0 : i32
    %c0_i32_1 = arith.constant 0 : i32
    return %c0_i32, %c0_i32_0 : i32, i32
  }
  func.func @transform_4(%arg0: i32) -> (i32, i32, i32) {
    %c0_i32 = arith.constant 0 : i32
    %c0_i32_0 = arith.constant 0 : i32
    %c0_i32_1 = arith.constant 0 : i32
    return %arg0, %c0_i32, %c0_i32_0 : i32, i32, i32
  }
}

</mosaic_0001>

<bundles_post_ra>
// kernel: tpu_custom_call.1
= control target key start
LH: loop header
LB: loop body
LE: loop exit
PB: predicated region body
PF: predicated region fallthrough
CT: control target
= control target key end

     0   :  { %9 = vsyncpa [#allocation3], 0  ;;  %s1957_s0 = inlined_call_operand.vmem [shape: f32[2,32,288], index: 0, kind: input, shape index: {}]   ;;  %s1958_s1 = inlined_call_operand.hbm [shape: f32[288,256], index: 1, kind: input, shape index: {}]   ;;  %s1959_s2 = inlined_call_operand.vmem [shape: f32[256,8], index: 2, kind: input, shape index: {}]   ;;  %s1960_s3 = inlined_call_operand.vmem [shape: f32[8,256], index: 3, kind: input, shape index: {}]   ;;  %s1961_s4 = inlined_call_operand.hbm [shape: f32[2,32,256], index: 4, kind: output, shape index: {}]  }
   0x1   :  { %10 = vsyncpa [#allocation4], 0 }
   0x2   :  { %12 = vsyncpa [#allocation4 + $0x1], 0  ;;  %s1539_s15 = smov 0   ;;  %s1541_s16 = smov 0  }
   0x3   :  { %s1543_s17 = smov 0   ;;  %s1545_s18 = smov 0  }
   0x4 LB: > { %s1560_s19 = sadd.s32 4294967295, %s1505_s18   ;;  %s1081_s20 = sadd.s32 4294967294, %s1505_s18   ;;  %s1505_s18 = sphi %s1545_s18, %s1977_s18   ;;  %s1501_s17 = sphi %s1543_s17, %s1976_s17   ;;  %s1497_s16 = sphi %s1541_s16, %s1975_s16   ;;  %s1493_s15 = sphi %s1539_s15, %s1974_s15  }
   0x5   : > { %s1564_s21 = sadd.s32 1, %s1505_s18   ;;  %s114_s22 = sadd.s32 1, %s1501_s17 }
   0x6   : > { %s111_s23 = ssub.s32 %s1505_s18, %s1564_s21  ;;  %p124_p0 = scmp.ne.s32.totalorder %s1501_s17, %s1497_s16 }
   0x7   : > { %p112_p1 = scmp.eq.s32.totalorder %s111_s23, 0  ;;  %p125_p2 = scmp.eq.s32.totalorder %s1560_s19, 1 }
   0x8   : > { %p130_p3 = scmp.ne.s32.totalorder %s1497_s16, %s1493_s15  ;;  %p131_p4 = scmp.eq.s32.totalorder %s1081_s20, 1 }
   0x9   : > { %s1575_s24 = scalar_select %p112_p1, %s1501_s17, %s114_s22  }
   0xa   : > { %p1577_p5 = por %p125_p2, %p124_p0  ;;  %p1581_p6 = por %p131_p4, %p130_p3 }
   0xb   : > { %p1082_p7 = scmp.ge.s32.totalorder %s1505_s18, 1  ;;  %p138_p8 = scmp.lt.s32.totalorder %s1505_s18, 3 }
   0xc   : > { %s1965_s25 = scalar_select %p1577_p5, 1, 0 }
   0xd   : > { %s1966_s26 = scalar_select %p1581_p6, 1, 0 }
   0xe   : > { %p1962_p9 = scmp.eq.s32.totalorder %s1560_s19, 0  ;;  %p1588_p10 = pnand %p1082_p7, %p138_p8 }
   0xf   : > { %s1507_s28 = smov [#allocation2]   ;;  %s1411_s7 = scalar_lea.hbm %s1958_s1, 9216 }
  0x10   : > { %s1967_s27 = scalar_select %p1588_p10, 1, 0 }
  0x11   : > { %s150_s29 = sshll.u32 %s1507_s28, 4  ;;  %p1358_p11 = pneg %p1588_p10  ;;  %s151_s29 = int_to_ptr.vmem [resolvable:$true] %s150_s29 }
  0x12   : > { %p1412_p13 = scmp.ne.s32.totalorder %s1958_s1, %s1411_s7  ;;  %p1418_p3 = scmp.lt.u32.totalorder %s1411_s7, %s1958_s1 }
  0x13   : > { %p1596_p12 = pnand %p1962_p9, %p1358_p11 }
  0x15   : > { %p1413_p0 = pneg %p1596_p12 }
  0x17   : > { %p1414_p1 = pnand %p1413_p0, %p1412_p13 }
  0x19   : > { %p1415_p2 = pneg %p1414_p1 }
  0x1b   : > { %p1420_p4 = pnand %p1418_p3, %p1415_p2 }
  0x1d   : > { %1423 = shalt.err (!%p1420_p4)
}
  0x1e   : > { %s1424_s12 = scalar_lea.vmem %s151_s29, 9216  ;;  %p1432_p9 = scmp.lt.s32.totalorder %s151_s29, %s151_s29 }
  0x1f   : > { %p1425_p7 = scmp.ne.s32.totalorder %s151_s29, %s1424_s12  ;;  %p1433_p6 = scmp.lt.s32.totalorder %s1424_s12, %s1424_s12 }
  0x21   : > { %p1427_p8 = pnand %p1425_p7, %p1413_p0  ;;  %p1434_p5 = por %p1433_p6, %p1432_p9 }
  0x23   : > { %p1428_p11 = pneg %p1427_p8 }
  0x25   : > { %p1435_p10 = pnand %p1434_p5, %p1428_p11 }
  0x27   : > { %1438 = shalt.err (!%p1435_p10)
}
  0x28   : > { %s1508_s13 = smov 256   ;;  %s1509_s14 = smov 16  }
  0x29   : > { %1361 = dma.hbm_to_vmem [thread:$0]  (!%p1596_p12), %s1958_s1, 9216, %s151_s29, [#allocation3], %s1508_s13, %s1508_s13, %s1509_s14  }
  0x2a   : > { %p1969_p13 = scmp.ne.s32.totalorder %s1967_s27, 0 }
  0x2b   : > { %p1970_p1 = scmp.eq.s32.totalorder (!%p1969_p13), %s1560_s19, 0 }
  0x2c   : > { %180 = sbr.rel (%p1969_p13) target bundleno = 1309 (0x51d), region = 36 }
  0x33   : > { %1484 = dma.done.wait (%p1970_p1), [#allocation3], 9216   ;;  %p1971_p0 = pmov %p1970_p1 }
  0x34   : > { %v1510_v0 = vmov 0.0   ;;  %v224_v1 = vld [vmem:[#allocation2 + $0x8] sm:$0xff]  ;;  %v226_v2 = vld [vmem:[#allocation2 + $0x18] sm:$0xff]  ;;  %v223_v3 = vld [vmem:[#allocation2] sm:$0xff]  ;;  %p206_p5 = scmp.lt.s32.totalorder %s1560_s19, 1  ;;  %vm295_vm0 = vcmask 261120  }
  0x35   : > { %1486 = vsyncadd (%p1971_p0), [#allocation3], 4294958080  ;;  %461 = vmatprep.mubr.f32.mxu1 %v1510_v0  ;;  %v1195_v4 = vpack.c.bf16 %v226_v2, %v224_v1  ;;  %v225_v5 = vld [vmem:[#allocation2 + $0x10] sm:$0xff]  ;;  %v228_v6 = vld [vmem:[#allocation2 + $0x28] sm:$0xff]  ;;  %vm605_vm1 = vcmask 64512   ;;  %s203_s8 = sand.u32 1, %s1497_s16  }
  0x36   : > { %v230_v7 = vld [vmem:[#allocation2 + $0x38] sm:$0xff]  ;;  %v1197_v8 = vpack.c.bf16 %v225_v5, %v223_v3  ;;  %v227_v10 = vld [vmem:[#allocation2 + $0x20] sm:$0xff]  ;;  %v229_v11 = vld [vmem:[#allocation2 + $0x30] sm:$0xff]  ;;  %s207_s23 = scalar_select %p206_p5, %s1560_s19, 1 }
  0x37   : > { %v1199_v9 = vpack.c.bf16 %v230_v7, %v228_v6  ;;  %v232_v12 = vld [vmem:[#allocation2 + $0x48] sm:$0xff]  ;;  %1196 = vmatprep.subr.bf16.mxu0 %v1195_v4  ;;  %v234_v13 = vld [vmem:[#allocation2 + $0x58] sm:$0xff]  ;;  %v1201_v14 = vpack.c.bf16 %v229_v11, %v227_v10  ;;  %v231_v16 = vld [vmem:[#allocation2 + $0x40] sm:$0xff]  ;;  %s1087_s9 = sshll.u32 %s203_s8, 6  ;;  %s1106_s10 = sshll.u32 %s1560_s19, 10 }
  0x38   : > { %1198 = vmatpush1.bf16.msra.mxu0 %v1197_v8  ;;  %v1203_v15 = vpack.c.bf16 %v234_v13, %v232_v12  ;;  %v233_v17 = vld [vmem:[#allocation2 + $0x50] sm:$0xff]  ;;  %v236_v18 = vld [vmem:[#allocation2 + $0x68] sm:$0xff]  ;;  %v238_v19 = vld [vmem:[#allocation2 + $0x78] sm:$0xff]  ;;  %s1351_s27 = smul.u32 96, %s207_s23  ;;  %s1892_s11 = scalar_lea.vmem [#allocation5], %s1087_s9 }
  0x39   : > { %1200 = vmatprep.subr.bf16.mxu0 %v1199_v9  ;;  %v1205_v20 = vpack.c.bf16 %v233_v17, %v231_v16  ;;  %v1207_v21 = vpack.c.bf16 %v238_v19, %v236_v18  ;;  %v235_v22 = vld [vmem:[#allocation2 + $0x60] sm:$0xff]  ;;  %v237_v23 = vld [vmem:[#allocation2 + $0x70] sm:$0xff]  ;;  %v240_v24 = vld [vmem:[#allocation2 + $0x88] sm:$0xff]  ;;  %s1007_s12 = sshll.u32 %s1892_s11, 4  ;;  %s1899_s14 = scalar_lea.hbm %s1961_s4, %s1106_s10  ;;  %s1901_s12 = int_to_ptr.vmem [resolvable:$true] %s1007_s12 }
  0x3a   : > { %v242_v25 = vld [vmem:[#allocation2 + $0x98] sm:$0xff]  ;;  %v1209_v26 = vpack.c.bf16 %v237_v23, %v235_v22  ;;  %v239_v28 = vld [vmem:[#allocation2 + $0x80] sm:$0xff]  ;;  %v241_v29 = vld [vmem:[#allocation2 + $0x90] sm:$0xff]  ;;  %s1628_s30 = scalar_lea.vmem %s1957_s0, %s1351_s27  ;;  %s1916_s20 = scalar_lea.sflag [#allocation4], %s203_s8 }
  0x3b   : > { %v1211_v27 = vpack.c.bf16 %v242_v25, %v240_v24  ;;  %v244_v30 = vld [vmem:[#allocation2 + $0xa8] sm:$0xff]  ;;  %v246_v31 = vld [vmem:[#allocation2 + $0xb8] sm:$0xff]  ;;  %v1213_v32 = vpack.c.bf16 %v241_v29, %v239_v28  ;;  %v243_v34 = vld [vmem:[#allocation2 + $0xa0] sm:$0xff]  ;;  %s1439_s22 = scalar_lea.vmem %s1901_s12, 1024  ;;  %p1972_p9 = scmp.ne.s32.totalorder %s1965_s25, 0 }
  0x3c   : > { %1202 = vmatpush1.bf16.msra.mxu0 %v1201_v14  ;;  %v1215_v33 = vpack.c.bf16 %v246_v31, %v244_v30  ;;  %v245_v35 = vld [vmem:[#allocation2 + $0xb0] sm:$0xff]  ;;  %v248_v36 = vld [vmem:[#allocation2 + $0xc8] sm:$0xff]  ;;  %v250_v37 = vld [vmem:[#allocation2 + $0xd8] sm:$0xff]  ;;  %p1440_p6 = scmp.ne.s32.totalorder %s1901_s12, %s1439_s22  ;;  %s1511_s23 = smov [#allocation5]  }
  0x3d   : > { %1204 = vmatprep.subr.bf16.mxu0 %v1203_v15  ;;  %v288_v38 = vld [vmem:[#allocation2 + $0x208] sm:$0xff]  ;;  %v290_v39 = vld [vmem:[#allocation2 + $0x218] sm:$0xff]  ;;  %v1217_v40 = vpack.c.bf16 %v245_v35, %v243_v34  ;;  %v247_v41 = vld [vmem:[#allocation2 + $0xc0] sm:$0xff]  ;;  %v1219_v45 = vpack.c.bf16 %v250_v37, %v248_v36  ;;  %s1443_s27 = sshll.u32 %s1511_s23, 4  ;;  %s1444_s27 = int_to_ptr.vmem [resolvable:$false] %s1443_s27 }
  0x3e   : > { %v1259_v42 = vpack.c.bf16 %v290_v39, %v288_v38  ;;  %v287_v43 = vld [vmem:[#allocation2 + $0x200] sm:$0xff]  ;;  %v289_v44 = vld [vmem:[#allocation2 + $0x210] sm:$0xff]  ;;  %v292_v48 = vld [vmem:[#allocation2 + $0x228] sm:$0xff]  ;;  %p1441_p10 = pnand %p1440_p6, %p1972_p9  ;;  %s1445_s28 = scalar_lea.vmem %s1444_s27, 2048 }
  0x3f   : > { %v249_v46 = vld [vmem:[#allocation2 + $0xd0] sm:$0xff]  ;;  %v1261_v47 = vpack.c.bf16 %v289_v44, %v287_v43  ;;  %v294_v49 = vld [vmem:[#allocation2 + $0x238] sm:$0xff]  ;;  %v252_v50 = vld [vmem:[#allocation2 + $0xe8] sm:$0xff]  ;;  %p1446_p2 = scmp.lt.s32.totalorder %s1901_s12, %s1444_s27  ;;  %p1447_p3 = scmp.lt.s32.totalorder %s1445_s28, %s1439_s22 }
  0x40   : > { %1206 = vmatpush1.bf16.msra.mxu0 %v1205_v20  ;;  %v254_v51 = vld [vmem:[#allocation2 + $0xf8] sm:$0xff]  ;;  %1260 = vmatprep.subr.bf16.mxu1 %v1259_v42  ;;  %v1263_v52 = vpack.c.bf16 %v294_v49, %v292_v48  ;;  %v291_v53 = vld [vmem:[#allocation2 + $0x220] sm:$0xff]  ;;  %v293_v54 = vld [vmem:[#allocation2 + $0x230] sm:$0xff]  ;;  %v1221_v55 = vpack.c.bf16 %v249_v46, %v247_v41  ;;  %p1442_p12 = pneg %p1441_p10 }
  0x41   : > { %1208 = vmatprep.subr.bf16.mxu0 %v1207_v21  ;;  %1262 = vmatpush1.bf16.msra.mxu1 %v1261_v47  ;;  %v1265_v56 = vpack.c.bf16 %v293_v54, %v291_v53  ;;  %v212_v57 = vld [vmem:[%s1628_s30 + $0x8] sm:$0xff]  ;;  %v1223_v58 = vpack.c.bf16 %v254_v51, %v252_v50  ;;  %v251_v59 = vld [vmem:[#allocation2 + $0xe0] sm:$0xff]  ;;  %v253_v60 = vld [vmem:[#allocation2 + $0xf0] sm:$0xff]  ;;  %p1448_p4 = por %p1447_p3, %p1446_p2 }
  0x42   : > { %1264 = vmatprep.subr.bf16.mxu1 %v1263_v52  ;;  %372 = vmatprep.mubr.f32.mxu0 %v212_v57  ;;  %v256_v61 = vld [vmem:[#allocation2 + $0x108] sm:$0xff]  ;;  %v258_v62 = vld [vmem:[#allocation2 + $0x118] sm:$0xff]  ;;  %v255_v63 = vld [vmem:[#allocation2 + $0x100] sm:$0xff]  ;;  %v1225_v3 = vpack.c.bf16 %v253_v60, %v251_v59 }
  0x43   : > { %v257_v1 = vld [vmem:[#allocation2 + $0x110] sm:$0xff]  ;;  %v260_v4 = vld [vmem:[#allocation2 + $0x128] sm:$0xff]  ;;  %v262_v5 = vld [vmem:[#allocation2 + $0x138] sm:$0xff]  ;;  %v1227_v9 = vpack.c.bf16 %v258_v62, %v256_v61  ;;  %p1449_p7 = pnand %p1448_p4, %p1442_p12 }
  0x44   : > { %1210 = vmatpush1.bf16.msra.mxu0 %v1209_v26  ;;  %v213_v2 = vld [vmem:[%s1628_s30 + $0x10] sm:$0xff]  ;;  %v502_v6 = vld [vmem:[%s1959_s2 + $0x80] sm:$0xff]  ;;  %v503_v7 = vld [vmem:[%s1959_s2 + $0x88] sm:$0xff]  ;;  %v1229_v21 = vpack.c.bf16 %v257_v1, %v255_v63  ;;  %v1231_v25 = vpack.c.bf16 %v262_v5, %v260_v4 }
  0x45   : > { %1212 = vmatprep.subr.bf16.mxu0 %v1211_v27  ;;  %1266 = vmatpush1.bf16.msra.mxu1 %v1265_v56  ;;  %v486_v8 = vld [vmem:[%s1959_s2] sm:$0xff]  ;;  %v1641_v10 = vpack.c.bf16 %v503_v7, %v502_v6  ;;  %v487_v11 = vld [vmem:[%s1959_s2 + $0x8] sm:$0xff]  ;;  %v504_v12 = vld [vmem:[%s1959_s2 + $0x90] sm:$0xff] }
  0x46   : > { %v505_v13 = vld [vmem:[%s1959_s2 + $0x98] sm:$0xff]  ;;  %v1653_v14 = vpack.c.bf16 %v487_v11, %v486_v8  ;;  %v488_v16 = vld [vmem:[%s1959_s2 + $0x10] sm:$0xff]  ;;  %v506_v18 = vld [vmem:[%s1959_s2 + $0xa0] sm:$0xff] }
  0x47   : > { %v1655_v15 = vpack.c.bf16 %v505_v13, %v504_v12  ;;  %v489_v17 = vld [vmem:[%s1959_s2 + $0x18] sm:$0xff]  ;;  %v216_v19 = vld [vmem:[%s1628_s30 + $0x28] sm:$0xff]  ;;  %1268 = vmatprep.subr.bf16.mxu1 %v1641_v10  ;;  %v259_v22 = vld [vmem:[#allocation2 + $0x120] sm:$0xff] }
  0x48   : > { %1214 = vmatpush1.bf16.msra.mxu0 %v1213_v32  ;;  %1089 = vmatmul.mubr.msk.f32.vlgmr.msra.gmra.mrb[0].mxu1 %vm295_vm0, %v213_v2  ;;  %v507_v20 = vld [vmem:[%s1959_s2 + $0xa8] sm:$0xff]  ;;  %v261_v23 = vld [vmem:[#allocation2 + $0x130] sm:$0xff]  ;;  %v1673_v24 = vpack.c.bf16 %v489_v17, %v488_v16  ;;  %v490_v28 = vld [vmem:[%s1959_s2 + $0x20] sm:$0xff] }
  0x49   : > { %1216 = vmatprep.subr.bf16.mxu0 %v1215_v33  ;;  %467 = vmatprep.mubr.f32.mxu1 %v1510_v0  ;;  %v264_v26 = vld [vmem:[#allocation2 + $0x148] sm:$0xff]  ;;  %v1676_v27 = vpack.c.bf16 %v507_v20, %v506_v18  ;;  %v266_v30 = vld [vmem:[#allocation2 + $0x158] sm:$0xff]  ;;  %v508_v31 = vld [vmem:[%s1959_s2 + $0xb0] sm:$0xff]  ;;  %v1233_v34 = vpack.c.bf16 %v261_v23, %v259_v22 }
  0x4a   : > { %1270 = vmatpush3.bf16.msra.mxu1 %v1653_v14  ;;  %v491_v29 = vld [vmem:[%s1959_s2 + $0x28] sm:$0xff]  ;;  %v509_v32 = vld [vmem:[%s1959_s2 + $0xb8] sm:$0xff]  ;;  %v219_v33 = vld [vmem:[%s1628_s30 + $0x40] sm:$0xff]  ;;  %v1235_v38 = vpack.c.bf16 %v266_v30, %v264_v26 }
  0x4b   : > { %1272 = vmatprep.subr.bf16.mxu1 %v1655_v15  ;;  %v263_v35 = vld [vmem:[#allocation2 + $0x140] sm:$0xff]  ;;  %v265_v36 = vld [vmem:[#allocation2 + $0x150] sm:$0xff]  ;;  %v1694_v37 = vpack.c.bf16 %v491_v29, %v490_v28  ;;  %v268_v39 = vld [vmem:[#allocation2 + $0x168] sm:$0xff] }
  0x4c   : > { %1218 = vmatpush1.bf16.msra.mxu0 %v1217_v40  ;;  %1090 = vmatmul.mubr.msk.f32.gmra.mrb[2].mxu1 %vm295_vm0, %v216_v19  ;;  %v1697_v40 = vpack.c.bf16 %v509_v32, %v508_v31  ;;  %v492_v41 = vld [vmem:[%s1959_s2 + $0x30] sm:$0xff]  ;;  %v493_v42 = vld [vmem:[%s1959_s2 + $0x38] sm:$0xff]  ;;  %v510_v44 = vld [vmem:[%s1959_s2 + $0xc0] sm:$0xff]  ;;  %v1237_v47 = vpack.c.bf16 %v265_v36, %v263_v35 }
  0x4d   : > { %1220 = vmatprep.subr.bf16.mxu0 %v1219_v45  ;;  %473 = vmatprep.mubr.f32.mxu1 %v1510_v0  ;;  %v270_v43 = vld [vmem:[#allocation2 + $0x178] sm:$0xff]  ;;  %v511_v45 = vld [vmem:[%s1959_s2 + $0xc8] sm:$0xff]  ;;  %v267_v48 = vld [vmem:[#allocation2 + $0x160] sm:$0xff]  ;;  %v1715_v50 = vpack.c.bf16 %v493_v42, %v492_v41 }
  0x4e   : > { %1274 = vmatpush3.bf16.msra.mxu1 %v1673_v24  ;;  %v222_v46 = vld [vmem:[%s1628_s30 + $0x58] sm:$0xff]  ;;  %v269_v49 = vld [vmem:[#allocation2 + $0x170] sm:$0xff]  ;;  %v1239_v51 = vpack.c.bf16 %v270_v43, %v268_v39  ;;  %v272_v52 = vld [vmem:[#allocation2 + $0x188] sm:$0xff]  ;;  %v1718_v53 = vpack.c.bf16 %v511_v45, %v510_v44 }
  0x4f   : > { %1276 = vmatprep.subr.bf16.mxu1 %v1676_v27  ;;  %v494_v54 = vld [vmem:[%s1959_s2 + $0x40] sm:$0xff]  ;;  %v274_v56 = vld [vmem:[#allocation2 + $0x198] sm:$0xff]  ;;  %v512_v57 = vld [vmem:[%s1959_s2 + $0xd0] sm:$0xff]  ;;  %v1241_v59 = vpack.c.bf16 %v269_v49, %v267_v48 }
  0x50   : > { %1222 = vmatpush1.bf16.msra.mxu0 %v1221_v55  ;;  %1091 = vmatmul.mubr.msk.f32.gmra.mrb[4].mxu1 %vm295_vm0, %v219_v33  ;;  %v495_v55 = vld [vmem:[%s1959_s2 + $0x48] sm:$0xff]  ;;  %v271_v60 = vld [vmem:[#allocation2 + $0x180] sm:$0xff]  ;;  %v273_v61 = vld [vmem:[#allocation2 + $0x190] sm:$0xff]  ;;  %v1243_v63 = vpack.c.bf16 %v274_v56, %v272_v52 }
  0x51   : > { %1224 = vmatprep.subr.bf16.mxu0 %v1223_v58  ;;  %479 = vmatprep.mubr.f32.mxu1 %v1510_v0  ;;  %v513_v58 = vld [vmem:[%s1959_s2 + $0xd8] sm:$0xff]  ;;  %v1734_v62 = vpack.c.bf16 %v495_v55, %v494_v54  ;;  %v276_v1 = vld [vmem:[#allocation2 + $0x1a8] sm:$0xff]  ;;  %v514_v6 = vld [vmem:[%s1959_s2 + $0xe0] sm:$0xff]  ;;  %v1245_v8 = vpack.c.bf16 %v273_v61, %v271_v60 }
  0x52   : > { %1278 = vmatpush3.bf16.msra.mxu1 %v1694_v37  ;;  %v1737_v2 = vpack.c.bf16 %v513_v58, %v512_v57  ;;  %v497_v4 = vld [vmem:[%s1959_s2 + $0x58] sm:$0xff]  ;;  %v515_v7 = vld [vmem:[%s1959_s2 + $0xe8] sm:$0xff]  ;;  %v277_v13 = vld [vmem:[#allocation2 + $0x1b0] sm:$0xff] }
  0x53   : > { %1280 = vmatprep.subr.bf16.mxu1 %v1697_v40  ;;  %v278_v5 = vld [vmem:[#allocation2 + $0x1b8] sm:$0xff]  ;;  %v1755_v16 = vpack.c.bf16 %v515_v7, %v514_v6  ;;  %v498_v17 = vld [vmem:[%s1959_s2 + $0x60] sm:$0xff]  ;;  %v499_v18 = vld [vmem:[%s1959_s2 + $0x68] sm:$0xff] }
  0x54   : > { %1226 = vmatpush1.bf16.msra.mxu0 %v1225_v3  ;;  %1092 = vmatmul.mubr.msk.f32.gmra.mrb[6].mxu1 %vm295_vm0, %v222_v46  ;;  %v496_v3 = vld [vmem:[%s1959_s2 + $0x50] sm:$0xff]  ;;  %v1247_v12 = vpack.c.bf16 %v278_v5, %v276_v1  ;;  %v280_v19 = vld [vmem:[#allocation2 + $0x1c8] sm:$0xff]  ;;  %v282_v20 = vld [vmem:[#allocation2 + $0x1d8] sm:$0xff]  ;;  %v1764_v22 = vpack.c.bf16 %v499_v18, %v498_v17 }
  0x55   : > { %1228 = vmatprep.subr.bf16.mxu0 %v1227_v9  ;;  %v275_v9 = vld [vmem:[#allocation2 + $0x1a0] sm:$0xff]  ;;  %v1752_v11 = vpack.c.bf16 %v497_v4, %v496_v3  ;;  %v1251_v23 = vpack.c.bf16 %v282_v20, %v280_v19  ;;  %v281_v26 = vld [vmem:[#allocation2 + $0x1d0] sm:$0xff]  ;;  %v284_v28 = vld [vmem:[#allocation2 + $0x1e8] sm:$0xff] }
  0x56   : > { %1282 = vmatpush3.bf16.msra.mxu1 %v1715_v50  ;;  %v286_v29 = vld [vmem:[#allocation2 + $0x1f8] sm:$0xff]  ;;  %v283_v32 = vld [vmem:[#allocation2 + $0x1e0] sm:$0xff]  ;;  %v285_v33 = vld [vmem:[#allocation2 + $0x1f0] sm:$0xff] }
  0x57   : > { %1284 = vmatprep.subr.bf16.mxu1 %v1718_v53  ;;  %v1255_v31 = vpack.c.bf16 %v286_v29, %v284_v28  ;;  %v211_v35 = vld [vmem:[%s1628_s30] sm:$0xff]  ;;  %v218_v39 = vld [vmem:[%s1628_s30 + $0x38] sm:$0xff]  ;;  %v217_v41 = vld [vmem:[%s1628_s30 + $0x30] sm:$0xff] }
  0x58   : > { %1230 = vmatpush1.bf16.msra.mxu0 %v1229_v21  ;;  %v1249_v21 = vpack.c.bf16 %v277_v13, %v275_v9  ;;  %v215_v36 = vld [vmem:[%s1628_s30 + $0x20] sm:$0xff]  ;;  %v221_v42 = vld [vmem:[%s1628_s30 + $0x50] sm:$0xff]  ;;  %v220_v43 = vld [vmem:[%s1628_s30 + $0x48] sm:$0xff] }
  0x59   : > { %1232 = vmatprep.subr.bf16.mxu0 %v1231_v25  ;;  %v279_v25 = vld [vmem:[#allocation2 + $0x1c0] sm:$0xff]  ;;  %v516_v44 = vld [vmem:[%s1959_s2 + $0xf0] sm:$0xff]  ;;  %v517_v45 = vld [vmem:[%s1959_s2 + $0xf8] sm:$0xff] }
  0x5a   : > { %1286 = vmatpush3.bf16.msra.mxu1 %v1734_v62  ;;  %v1253_v30 = vpack.c.bf16 %v281_v26, %v279_v25  ;;  %v1782_v46 = vpack.c.bf16 %v517_v45, %v516_v44  ;;  %v501_v48 = vld [vmem:[%s1959_s2 + $0x78] sm:$0xff]  ;;  %v603_v52 = vld [vmem:[%s1960_s3] sm:$0xff] }
  0x5b   : > { %1288 = vmatprep.subr.bf16.mxu1 %v1737_v2 }
  0x5c   : > { %1234 = vmatpush1.bf16.msra.mxu0 %v1233_v34  ;;  %v1257_v34 = vpack.c.bf16 %v285_v33, %v283_v32 }
  0x5d   : > { %1236 = vmatprep.subr.bf16.mxu0 %v1235_v38  ;;  %v214_v38 = vld [vmem:[%s1628_s30 + $0x18] sm:$0xff] }
  0x5e   : > { %1290 = vmatpush3.bf16.msra.mxu1 %v1752_v11 }
  0x5f   : > { %1292 = vmatprep.subr.bf16.mxu1 %v1755_v16 }
  0x60   : > { %1238 = vmatpush1.bf16.msra.mxu0 %v1237_v47  ;;  %v500_v47 = vld [vmem:[%s1959_s2 + $0x70] sm:$0xff] }
  0x61   : > { %1240 = vmatprep.subr.bf16.mxu0 %v1239_v51  ;;  %v1790_v49 = vpack.c.bf16 %v501_v48, %v500_v47  ;;  %v604_v51 = vld [vmem:[%s1960_s3 + $0x8] sm:$0xff] }
  0x62   : > { %1294 = vmatpush3.bf16.msra.mxu1 %v1764_v22 }
  0x63   : > { %1296 = vmatprep.subr.bf16.mxu1 %v1782_v46 }
  0x64   : > { %1242 = vmatpush1.bf16.msra.mxu0 %v1241_v59 }
  0x65   : > { %1244 = vmatprep.subr.bf16.mxu0 %v1243_v63 }
  0x66   : > { %1298 = vmatpush3.bf16.msra.mxu1 %v1790_v49 }
  0x67   : > { %618 = vmatprep.subr.mxu1 %v604_v51 }
  0x68   : > { %1246 = vmatpush1.bf16.msra.mxu0 %v1245_v8 }
  0x69   : > { %1248 = vmatprep.subr.bf16.mxu0 %v1247_v12 }
  0x6c   : > { %1250 = vmatpush1.bf16.msra.mxu0 %v1249_v21 }
  0x6d   : > { %1252 = vmatprep.subr.bf16.mxu0 %v1251_v23 }
  0x70   : > { %1254 = vmatpush1.bf16.msra.mxu0 %v1253_v30 }
  0x71   : > { %1256 = vmatprep.subr.bf16.mxu0 %v1255_v31 }
  0x74   : > { %1258 = vmatpush1.bf16.msra.mxu0 %v1257_v34 }
  0x75   : > { %840 = vmatprep.subr.mxu0 %v604_v51 }
  0x77   : > { %373 = vmatmul.mubr.f32.vlgmr.msra.gmra.mrb[0].mxu0 %v211_v35 }
  0x78   : > { %378 = vmatprep.mubr.f32.mxu0 %v215_v36  ;;  %841 = vmatpush1.msra.mxu0 %v603_v52 }
  0x7b   : > { %379 = vmatmul.mubr.f32.gmra.mrb[2].mxu0 %v214_v38 }
  0x7c   : > { %384 = vmatprep.mubr.f32.mxu0 %v218_v39 }
  0x7f   : > { %385 = vmatmul.mubr.f32.gmra.mrb[4].mxu0 %v217_v41 }
  0x80   : > { %390 = vmatprep.mubr.f32.mxu0 %v221_v42 }
  0x83   : > { %391 = vmatmul.mubr.f32.gmra.mrb[6].mxu0 %v220_v43 }
  0x84   : > { %904 = vmatprep.mubr.f32.mxu0 %v1510_v0 }
 0x11b   : > { %v463_v54 = vpop.f32.mrb[0].mxu1 }
 0x11c   : > { %v465_v55 = vpop.f32.mrb[1].mxu1 }
 0x11f   : > { %v469_v56 = vpop.f32.mrb[2].mxu1 }
 0x120   : > { %v471_v57 = vpop.f32.mrb[3].mxu1 }
 0x123   : > { %v475_v58 = vpop.f32.mrb[4].mxu1 }
 0x124   : > { %v477_v59 = vpop.f32.mrb[5].mxu1 }
 0x127   : > { %v481_v60 = vpop.f32.mrb[6].mxu1 }
 0x128   : > { %v483_v61 = vpop.f32.mrb[7].mxu1 }
 0x14a   : > { %v374_v63 = vpop.f32.mrb[0].mxu0 }
 0x14b   : > { %v1800_v1 = vadd.f32 %v463_v54, %v374_v63  ;;  %v376_v3 = vpop.f32.mrb[1].mxu0 }
 0x14c   : > { %v1802_v4 = vadd.f32 %v465_v55, %v376_v3 }
 0x14e   : > { %582 = vmatprep.mubr.f32.mxu1 %v1802_v4  ;;  %v380_v5 = vpop.f32.mrb[2].mxu0 }
 0x14f   : > { %v1805_v6 = vadd.f32 %v469_v56, %v380_v5  ;;  %583 = vmatmul.mubr.f32.vlgmr.msra.gmra.mrb[8].mxu1 %v1800_v1  ;;  %v382_v7 = vpop.f32.mrb[3].mxu0 }
 0x150   : > { %v1808_v8 = vadd.f32 %v471_v57, %v382_v7  ;;  %619 = vmatpush1.msra.mxu1 %v603_v52 }
 0x151   : > { %1300 = vmatprep.subr.bf16.mxu1 %v1641_v10 }
 0x152   : > { %587 = vmatprep.mubr.f32.mxu1 %v1808_v8  ;;  %v386_v9 = vpop.f32.mrb[4].mxu0 }
 0x153   : > { %588 = vmatmul.mubr.f32.gmra.mrb[10].mxu1 %v1805_v6  ;;  %v1813_v12 = vadd.f32 %v475_v58, %v386_v9  ;;  %v388_v13 = vpop.f32.mrb[5].mxu0 }
 0x154   : > { %v1815_v17 = vadd.f32 %v477_v59, %v388_v13 }
 0x156   : > { %592 = vmatprep.mubr.f32.mxu1 %v1815_v17  ;;  %v392_v18 = vpop.f32.mrb[6].mxu0 }
 0x157   : > { %593 = vmatmul.mubr.f32.gmra.mrb[12].mxu1 %v1813_v12  ;;  %v1819_v19 = vadd.f32 %v481_v60, %v392_v18  ;;  %v394_v20 = vpop.f32.mrb[7].mxu0 }
 0x158   : > { %v1821_v21 = vadd.f32 %v483_v61, %v394_v20 }
 0x15a   : > { %597 = vmatprep.mubr.f32.mxu1 %v1821_v21 }
 0x15b   : > { %598 = vmatmul.mubr.f32.gmra.mrb[14].mxu1 %v1819_v19 }
 0x15c   : > { %682 = vmatprep.mubr.f32.mxu1 %v1510_v0 }
 0x222   : > { %v1139_v10 = vpop.f32.mrb[8].mxu1 }
 0x223   : > { %v1140_v23 = vpop.f32.mrb[9].mxu1 }
 0x224   : > { %v1141_v25 = vadd.f32 %v1140_v23, %v1139_v10 }
 0x226   : > { %1093 = vmatmul.mubr.msk.f32.vlgmr.msra.gmra.mrb[16].mxu1 %vm605_vm1, %v1141_v25  ;;  %v1142_v26 = vpop.f32.mrb[10].mxu1 }
 0x227   : > { %v1143_v28 = vpop.f32.mrb[11].mxu1  ;;  %688 = vmatprep.mubr.f32.mxu1 %v1510_v0  ;;  %1302 = vmatpush3.bf16.msra.mxu1 %v1653_v14 }
 0x228   : > { %v1144_v29 = vadd.f32 %v1143_v28, %v1142_v26  ;;  %1304 = vmatprep.subr.bf16.mxu1 %v1655_v15 }
 0x22a   : > { %v1145_v30 = vpop.f32.mrb[12].mxu1 }
 0x22b   : > { %v1146_v31 = vpop.f32.mrb[13].mxu1  ;;  %1306 = vmatpush3.bf16.msra.mxu1 %v1673_v24 }
 0x22c   : > { %v1147_v32 = vadd.f32 %v1146_v31, %v1145_v30  ;;  %1308 = vmatprep.subr.bf16.mxu1 %v1676_v27 }
 0x22e   : > { %1094 = vmatmul.mubr.msk.f32.gmra.mrb[16].mxu1 %vm605_vm1, %v1144_v29  ;;  %v1148_v33 = vpop.f32.mrb[14].mxu1 }
 0x22f   : > { %694 = vmatprep.mubr.f32.mxu1 %v1510_v0  ;;  %v1149_v34 = vpop.f32.mrb[15].mxu1  ;;  %1310 = vmatpush3.bf16.msra.mxu1 %v1694_v37 }
 0x230   : > { %v1150_v35 = vadd.f32 %v1149_v34, %v1148_v33  ;;  %1312 = vmatprep.subr.bf16.mxu1 %v1697_v40 }
 0x233   : > { %1314 = vmatpush3.bf16.msra.mxu1 %v1715_v50 }
 0x234   : > { %1316 = vmatprep.subr.bf16.mxu1 %v1718_v53 }
 0x236   : > { %1095 = vmatmul.mubr.msk.f32.gmra.mrb[16].mxu1 %vm605_vm1, %v1147_v32 }
 0x237   : > { %700 = vmatprep.mubr.f32.mxu1 %v1510_v0  ;;  %1318 = vmatpush3.bf16.msra.mxu1 %v1734_v62 }
 0x238   : > { %1320 = vmatprep.subr.bf16.mxu1 %v1737_v2 }
 0x23b   : > { %1322 = vmatpush3.bf16.msra.mxu1 %v1752_v11 }
 0x23c   : > { %1324 = vmatprep.subr.bf16.mxu1 %v1755_v16 }
 0x23e   : > { %1096 = vmatmul.mubr.msk.f32.gmra.mrb[16].mxu1 %vm605_vm1, %v1150_v35 }
 0x23f   : > { %1326 = vmatpush3.bf16.msra.mxu1 %v1764_v22 }
 0x240   : > { %1328 = vmatprep.subr.bf16.mxu1 %v1782_v46 }
 0x243   : > { %1330 = vmatpush3.bf16.msra.mxu1 %v1790_v49 }
 0x311   : > { %v702_v14 = vpop.f32.mrb[16].mxu1 }
 0x312   : > { %v710_v15 = vrot.slane %v702_v14, 4  ;;  %v704_v24 = vpop.f32.mrb[17].mxu1 }
 0x313   : > { %v719_v27 = vrot.slane %v704_v24, 4 }
 0x314   : > { %v711_v37 = vadd.f32 %v710_v15, %v702_v14 }
 0x315   : > { %v720_v40 = vadd.f32 %v719_v27, %v704_v24 }
 0x316   : > { %v712_v50 = vrot.slane %v711_v37, 2 }
 0x317   : > { %v721_v53 = vrot.slane %v720_v40, 2 }
 0x318   : > { %v713_v62 = vadd.f32 %v712_v50, %v711_v37 }
 0x319   : > { %v722_v2 = vadd.f32 %v721_v53, %v720_v40 }
 0x31a   : > { %v714_v11 = vrot.slane %v713_v62, 1 }
 0x31b   : > { %v723_v16 = vrot.slane %v722_v2, 1 }
 0x31c   : > { %v715_v36 = vadd.f32 %v714_v11, %v713_v62 }
 0x31d   : > { %v724_v38 = vadd.f32 %v723_v16, %v722_v2 }
 0x31e   : > { %v725_v39 = vmul.f32 0.0009765625, %v715_v36 }
 0x31f   : > { %v726_v22 = vmul.f32 0.0009765625, %v724_v38 }
 0x320   : > { %v1849_v41 = vsub.f32 %v1800_v1, %v725_v39  ;;  %v1862_v46 = vsub.f32 %v1805_v6, %v725_v39  ;;  %v731_v51 = vsub.f32 %v1813_v12, %v725_v39  ;;  %v733_v56 = vsub.f32 %v1819_v19, %v725_v39 }
 0x321   : > { %v1852_v42 = vsub.f32 %v1802_v4, %v726_v22  ;;  %v1855_v43 = vsub.f32 %v1808_v8, %v726_v22  ;;  %v1867_v48 = vsub.f32 %v1815_v17, %v726_v22  ;;  %v734_v54 = vsub.f32 %v1821_v21, %v726_v22 }
 0x322   : > { %v735_v45 = vmul.f32 %v1849_v41, %v1849_v41  ;;  %v737_v49 = vmul.f32 %v1862_v46, %v1862_v46  ;;  %v739_v55 = vmul.f32 %v731_v51, %v731_v51  ;;  %v741_v58 = vmul.f32 %v733_v56, %v733_v56 }
 0x323   : > { %v736_v44 = vmul.f32 %v1852_v42, %v1852_v42  ;;  %v738_v47 = vmul.f32 %v1855_v43, %v1855_v43  ;;  %v740_v52 = vmul.f32 %v1867_v48, %v1867_v48  ;;  %v742_v57 = vmul.f32 %v734_v54, %v734_v54 }
 0x325   : > { %807 = vmatprep.mubr.f32.mxu1 %v736_v44 }
 0x326   : > { %808 = vmatmul.mubr.f32.vlgmr.msra.gmra.mrb[18].mxu1 %v735_v45 }
 0x327   : > { %812 = vmatprep.mubr.f32.mxu1 %v738_v47 }
 0x32a   : > { %813 = vmatmul.mubr.f32.gmra.mrb[20].mxu1 %v737_v49 }
 0x32b   : > { %817 = vmatprep.mubr.f32.mxu1 %v740_v52 }
 0x32e   : > { %818 = vmatmul.mubr.f32.gmra.mrb[22].mxu1 %v739_v55 }
 0x32f   : > { %822 = vmatprep.mubr.f32.mxu1 %v742_v57 }
 0x332   : > { %823 = vmatmul.mubr.f32.gmra.mrb[24].mxu1 %v741_v58 }
 0x3f9   : > { %v1183_v59 = vpop.f32.mrb[18].mxu1 }
 0x3fa   : > { %v1184_v60 = vpop.f32.mrb[19].mxu1 }
 0x3fb   : > { %v1185_v61 = vadd.f32 %v1184_v60, %v1183_v59 }
 0x3fd   : > { %v1186_v63 = vpop.f32.mrb[20].mxu1  ;;  %1097 = vmatmul.mubr.msk.f32.vlgmr.msra.gmra.mrb[8].mxu0 %vm605_vm1, %v1185_v61 }
 0x3fe   : > { %v1187_v1 = vpop.f32.mrb[21].mxu1  ;;  %910 = vmatprep.mubr.f32.mxu0 %v1510_v0 }
 0x3ff   : > { %v1188_v3 = vadd.f32 %v1187_v1, %v1186_v63 }
 0x401   : > { %v1189_v4 = vpop.f32.mrb[22].mxu1 }
 0x402   : > { %v1190_v5 = vpop.f32.mrb[23].mxu1 }
 0x403   : > { %v1191_v6 = vadd.f32 %v1190_v5, %v1189_v4 }
 0x405   : > { %v1192_v7 = vpop.f32.mrb[24].mxu1  ;;  %1098 = vmatmul.mubr.msk.f32.gmra.mrb[8].mxu0 %vm605_vm1, %v1188_v3 }
 0x406   : > { %v1193_v8 = vpop.f32.mrb[25].mxu1  ;;  %916 = vmatprep.mubr.f32.mxu0 %v1510_v0 }
 0x407   : > { %v1194_v9 = vadd.f32 %v1193_v8, %v1192_v7 }
 0x40d   : > { %1099 = vmatmul.mubr.msk.f32.gmra.mrb[8].mxu0 %vm605_vm1, %v1191_v6 }
 0x40e   : > { %922 = vmatprep.mubr.f32.mxu0 %v1510_v0 }
 0x415   : > { %1100 = vmatmul.mubr.msk.f32.gmra.mrb[8].mxu0 %vm605_vm1, %v1194_v9 }
 0x4e8   : > { %v924_v12 = vpop.f32.mrb[8].mxu0 }
 0x4e9   : > { %v932_v13 = vrot.slane %v924_v12, 4  ;;  %v926_v17 = vpop.f32.mrb[9].mxu0 }
 0x4ea   : > { %v941_v18 = vrot.slane %v926_v17, 4 }
 0x4eb   : > { %v933_v19 = vadd.f32 %v932_v13, %v924_v12 }
 0x4ec   : > { %v942_v20 = vadd.f32 %v941_v18, %v926_v17 }
 0x4ed   : > { %v934_v21 = vrot.slane %v933_v19, 2 }
 0x4ee   : > { %v943_v10 = vrot.slane %v942_v20, 2 }
 0x4ef   : > { %v935_v23 = vadd.f32 %v934_v21, %v933_v19 }
 0x4f0   : > { %v944_v25 = vadd.f32 %v943_v10, %v942_v20 }
 0x4f1   : > { %v936_v26 = vrot.slane %v935_v23, 1 }
 0x4f2   : > { %v945_v28 = vrot.slane %v944_v25, 1 }
 0x4f3   : > { %v937_v29 = vadd.f32 %v936_v26, %v935_v23 }
 0x4f4   : > { %v946_v30 = vadd.f32 %v945_v28, %v944_v25 }
 0x4f5   : > { %v947_v31 = vmul.f32 0.0009765625, %v937_v29 }
 0x4f6   : > { %v948_v0 = vmul.f32 0.0009765625, %v946_v30 }
 0x4f7   : > { %v949_v32 = vadd.f32 1e-05, %v947_v31 }
 0x4f8   : > { %v950_v33 = vadd.f32 1e-05, %v948_v0 }
 0x4f9   : > { %1407 = vrsqrt.f32 %v949_v32 }
 0x4fa   : > { %1409 = vrsqrt.f32 %v950_v33 }
 0x503   : > { %v1408_v34 = vpop.eup %1407 }
 0x504   : > { %v1410_v35 = vpop.eup %1409  ;;  %v953_v14 = vmul.f32 %v1408_v34, %v1849_v41  ;;  %v955_v15 = vmul.f32 %v1408_v34, %v1862_v46  ;;  %v957_v24 = vmul.f32 %v1408_v34, %v731_v51  ;;  %v959_v27 = vmul.f32 %v1408_v34, %v733_v56 }
 0x505   : > { %v954_v37 = vmul.f32 %v1410_v35, %v1852_v42  ;;  %v956_v40 = vmul.f32 %v1410_v35, %v1855_v43  ;;  %v958_v50 = vmul.f32 %v1410_v35, %v1867_v48  ;;  %v960_v53 = vmul.f32 %v1410_v35, %v734_v54 }
 0x506   : > { %vm961_vm2 = vcmp.gt.f32.partialorder %v953_v14, 0.0  ;;  %vm963_vm3 = vcmp.gt.f32.partialorder %v955_v15, 0.0  ;;  %vm965_vm4 = vcmp.gt.f32.partialorder %v957_v24, 0.0  ;;  %vm967_vm5 = vcmp.gt.f32.partialorder %v959_v27, 0.0 }
 0x507   : > { %v970_v62 = vmul.f32 0.2, %v954_v37  ;;  %v972_v2 = vmul.f32 0.2, %v956_v40  ;;  %v974_v11 = vmul.f32 0.2, %v958_v50 }
 0x508   : > { %v976_v16 = vmul.f32 0.2, %v960_v53  ;;  %vm962_vm6 = vcmp.gt.f32.partialorder %v954_v37, 0.0  ;;  %vm964_vm7 = vcmp.gt.f32.partialorder %v956_v40, 0.0  ;;  %vm966_vm8 = vcmp.gt.f32.partialorder %v958_v50, 0.0 }
 0x509   : > { %vm968_vm9 = vcmp.gt.f32.partialorder %v960_v53, 0.0  ;;  %v969_v36 = vmul.f32 0.2, %v953_v14  ;;  %v971_v38 = vmul.f32 0.2, %v955_v15  ;;  %v978_v39 = vsel %vm962_vm6, %v954_v37, %v970_v62 }
 0x50a   : > { %v973_v22 = vmul.f32 0.2, %v957_v24  ;;  %v975_v41 = vmul.f32 0.2, %v959_v27  ;;  %v980_v42 = vsel %vm964_vm7, %v956_v40, %v972_v2  ;;  %v982_v43 = vsel %vm966_vm8, %v958_v50, %v974_v11  ;;  %986 = vst [vmem:[%s1892_s11 + $0x8] sm:$0xff] %v978_v39 }
 0x50b   : > { %v977_v44 = vsel %vm961_vm2, %v953_v14, %v969_v36  ;;  %v979_v45 = vsel %vm963_vm3, %v955_v15, %v971_v38  ;;  %v984_v46 = vsel %vm968_vm9, %v960_v53, %v976_v16  ;;  %988 = vst [vmem:[%s1892_s11 + $0x18] sm:$0xff] %v980_v42  ;;  %990 = vst [vmem:[%s1892_s11 + $0x28] sm:$0xff] %v982_v43 }
 0x50c   : > { %v981_v47 = vsel %vm965_vm4, %v957_v24, %v973_v22  ;;  %v983_v48 = vsel %vm967_vm5, %v959_v27, %v975_v41  ;;  %985 = vst [vmem:[%s1892_s11] sm:$0xff] %v977_v44  ;;  %987 = vst [vmem:[%s1892_s11 + $0x10] sm:$0xff] %v979_v45 }
 0x50d   : > { %992 = vst [vmem:[%s1892_s11 + $0x38] sm:$0xff] %v984_v46  ;;  %989 = vst [vmem:[%s1892_s11 + $0x20] sm:$0xff] %v981_v47 }
 0x50e   : > { %991 = vst [vmem:[%s1892_s11 + $0x30] sm:$0xff] %v983_v48 }
 0x50f   : > { %1452 = shalt.err (!%p1449_p7)
}
 0x510   : > { %s1453_s29 = scalar_lea.hbm %s1899_s14, 1024  ;;  %s1457_s6 = scalar_lea.hbm %s1961_s4, 2048 }
 0x511   : > { %p1454_p8 = scmp.ne.s32.totalorder %s1899_s14, %s1453_s29  ;;  %p1458_p1 = scmp.lt.u32.totalorder %s1899_s14, %s1961_s4 }
 0x512   : > { %p1459_p0 = scmp.lt.u32.totalorder %s1457_s6, %s1453_s29  ;;  %p1461_p6 = scmp.lt.u32.totalorder %s1453_s29, %s1899_s14 }
 0x513   : > { %p1455_p11 = pnand %p1454_p8, %p1972_p9 }
 0x514   : > { %p1460_p5 = por %p1459_p0, %p1458_p1 }
 0x515   : > { %p1456_p13 = pneg %p1455_p11 }
 0x516   : > { %p1462_p10 = por %p1461_p6, %p1460_p5 }
 0x518   : > { %p1463_p12 = pnand %p1462_p10, %p1456_p13 }
 0x51a   : > { %1466 = shalt.err (!%p1463_p12)
}
 0x51b   : > { %s1512_s9 = smov 256   ;;  %s1513_s10 = smov 16  }
 0x51c   : > { %1356 = dma.vmem_to_hbm [thread:$0]  (%p1972_p9), %s1901_s12, 1024, %s1899_s14, %s1916_s20, %s1512_s9, %s1512_s9, %s1513_s10  }
 0x51d PF: > { %p1368_p2 = scmp.ge.s32.totalorder %s1505_s18, 2  ;;  %s1022_s11 = sand.u32 1, %s1493_s15  }
 0x51e   : > { %p1973_p3 = scmp.ne.s32.totalorder %s1966_s26, 0  ;;  %s1023_s19 = scalar_lea.sflag [#allocation4], %s1022_s11 }
 0x520   : > { %p1363_p4 = pnand %p1368_p2, %p1973_p3 }
 0x522   : > { %1488 = dma.done.wait (!%p1363_p4), %s1023_s19, 1024  }
 0x523   : > { %1490 = vsyncadd (!%p1363_p4), %s1023_s19, 4294966272  ;;  %p15_p7 = scmp.ge.s32.totalorder %s1564_s21, 4   ;;  %s1974_s15 = smov %s1497_s16 }
 0x524   : > { %s1975_s16 = smov %s1501_s17  ;;  %s1976_s17 = smov %s1575_s24 }
 0x525   : > { %s1977_s18 = smov %s1564_s21  ;;  %17 = sbr.rel (!%p15_p7) target bundleno = 4 (0x4), region = 76 }
 0x52c   :  { %1028 = vsyncpa [#allocation3], 1 }
 0x52d   :  { %1030 = vsyncpa [#allocation3 + $0x1], 1 }
 0x52e   :  { %1031 = vsyncpa [#allocation4], 1 }
 0x52f   :  { %1033 = vsyncpa [#allocation4 + $0x1], 1 }

</bundles_post_ra>
